<compile_context>
chip_gen: v7x
topology: tpu7x:2x2x1
jax: 0.10.0
libtpu: 0.0.40
codegen_flags: <defaults>
</compile_context>

<pallas_src>
import numpy as np
import jax
import jax.numpy as jnp
from jax.experimental import pallas as pl
from jax.experimental.pallas import tpu as pltpu


# ----------------------------- configuration ------------------------------
VOCAB = 1000        # synthetic vocab (real bert-base-uncased would be 30522)
EMB = 32            # embedding size (folded away at init)
HID = 128           # hidden size (lane-dense)
LABELS = 3          # args['labels']
OUT_PAD = 128       # lane-dense padded logits width; real logits in [:LABELS]
PAD_ID = 0          # bert-base-uncased tokenizer.pad_token_id
MAX_SEQ = 512
TILE_B = 8          # batch rows per grid step (full sublane output tile)

args = {'dataset': 'snli', 'model': 'cnn', 'gpu': False,
        'seed': 73, 'labels': LABELS, 'batch_size': 2}


# ------------------------------ Pallas kernel ------------------------------
def _classifier_kernel(x_ref, s_ref, w2_ref, b2_ref, o_ref):
    """One grid step = TILE_B batch rows, everything for the step in VMEM.

    x:  (TILE_B, S, HID) bf16  gathered folded table rows  (= emb@W1 + b1)
    s:  (TILE_B, S)      f32   masked-mean weights mask[b,s] / len[b]
    w2: (HID, OUT_PAD)   bf16  head weights, zero-padded to 128 lanes (resident)
    b2: (1, OUT_PAD)     f32   head bias, zero-padded           (resident)
    o:  (TILE_B, OUT_PAD) f32  padded logits (lane-dense, unmasked stores)
    """
    # hidden = ReLU(emb@W1 + b1): the affine part is baked into the gather
    # table, so only the nonlinearity runs here (f32 VPU).
    h = jnp.maximum(x_ref[...].astype(jnp.float32), 0.0)        # (TB, S, HID)

    # Per-row masked mean pooling: multiply by mask/len and reduce over S.
    # (No dense BxBS pooling matrix; f32 keeps the 1/len factors exact.)
    pooled = jnp.sum(h * s_ref[...][..., None], axis=1)          # (TB, HID) f32

    # padded logits = pooled @ W2_pad + b2_pad  -> bf16 MXU, f32 accumulate.
    o_ref[...] = jnp.dot(pooled.astype(jnp.bfloat16), w2_ref[...],
                         preferred_element_type=jnp.float32) + b2_ref[...]


@jax.jit
def model_apply(params, tokens, attention_mask):
    """tokens [B,S] int32, attention_mask [B,S] bool -> logits [B, LABELS]."""
    B, S = tokens.shape
    n_tiles = int(pl.cdiv(B, TILE_B))
    Bp = n_tiles * TILE_B
    if Bp != B:                                   # static-shape pad to tile
        tokens = jnp.pad(tokens, ((0, Bp - B), (0, 0)))
        attention_mask = jnp.pad(attention_mask, ((0, Bp - B), (0, 0)))

    # Gather of the pre-folded bf16 table: data-dependent gather stays in XLA,
    # but there is no separate f32 materialization / cast / first matmul.
    x = jnp.take(params['ew1'], tokens, axis=0)                   # [Bp,S,HID] bf16
    mask = attention_mask.astype(jnp.float32)                     # [Bp,S]
    denom = jnp.maximum(jnp.sum(mask, axis=1, keepdims=True), 1.0)
    scale = mask / denom                                          # [Bp,S]

    padded = pl.pallas_call(
        _classifier_kernel,
        out_shape=jax.ShapeDtypeStruct((Bp, OUT_PAD), jnp.float32),
        grid=(n_tiles,),
        in_specs=[
            pl.BlockSpec((TILE_B, S, HID), lambda i: (i, 0, 0)),
            pl.BlockSpec((TILE_B, S), lambda i: (i, 0)),
            pl.BlockSpec((HID, OUT_PAD), lambda i: (0, 0)),   # resident weights
            pl.BlockSpec((1, OUT_PAD), lambda i: (0, 0)),     # resident bias
        ],
        out_specs=pl.BlockSpec((TILE_B, OUT_PAD), lambda i: (i, 0)),
        compiler_params=pltpu.CompilerParams(
            dimension_semantics=("parallel",)),               # 2x on v7x (2 TCs)
    )(x, scale, params['w2p'], params['b2p'])

    return padded[:B, :LABELS]


# ------------------------- synthetic model params --------------------------
def init_params(key):
    k_emb, k_w1, k_w2 = jax.random.split(key, 3)
    emb = 0.1 * jax.random.normal(k_emb, (VOCAB, EMB), jnp.float32)
    w1 = 0.1 * jax.random.normal(k_w1, (EMB, HID), jnp.float32)
    b1 = jnp.zeros((1, HID), jnp.float32)
    w2 = 0.1 * jax.random.normal(k_w2, (HID, LABELS), jnp.float32)
    w2p = jnp.zeros((HID, OUT_PAD), jnp.float32).at[:, :LABELS].set(w2)
    b2p = jnp.zeros((1, OUT_PAD), jnp.float32)
    # Fold the first layer (and its bias) into the embedding table: the kernel
    # then only needs ReLU + pooling + head matmul.
    ew1 = (emb @ w1 + b1).astype(jnp.bfloat16)                    # (VOCAB, HID)
    kernel_params = {'ew1': ew1,
                     'w2p': w2p.astype(jnp.bfloat16),
                     'b2p': b2p}
    ref_weights = {'emb': emb, 'w1': w1, 'b1': b1, 'w2p': w2p, 'b2p': b2p}
    return kernel_params, ref_weights


# ------------------------- BertModelWrapper (JAX) --------------------------
class BertModelWrapper:
    """Mirrors the PyTorch wrapper's forward: parse -> batch -> pad ->
    attention_mask = tokens > 0 -> model -> np.array of logits.

    The reference loops over mini-batches of args['batch_size'] and pads each
    to its own max length; since the classifier is padding-invariant under the
    attention mask, all instances are fused into ONE padded matrix and ONE
    gridded pallas_call (identical per-instance logits, far less dispatch
    overhead)."""

    def __init__(self, params, pad_token_id, args):
        self.params = params
        self.pad_token_id = pad_token_id
        self.args = args

    @staticmethod
    def _bucket(n):
        # Bucket padded length to a power of two (>=8, <=512) so distinct raw
        # lengths reuse one compiled program instead of recompiling per request.
        return int(min(max(8, pl.next_power_of_2(max(n, 1))), MAX_SEQ))

    def forward(self, token_ids):
        token_ids = [[int(i) for i in instance_ids.split(' ') if i != '']
                     for instance_ids in token_ids]
        n = len(token_ids)
        # Truncate to 512 (same effective truncation as per-mini-batch max).
        token_ids = [_l[:MAX_SEQ] for _l in token_ids]
        max_len = max(len(_l) for _l in token_ids)
        s_pad = self._bucket(max_len)
        padded_ids = [_l + [self.pad_token_id] * (s_pad - len(_l))
                      for _l in token_ids]
        # Pad the batch dim to a multiple of TILE_B with all-pad rows so every
        # request hits the same warm executable (rows are masked out / sliced).
        n_pad = int(pl.cdiv(n, TILE_B)) * TILE_B
        padded_ids += [[self.pad_token_id] * s_pad] * (n_pad - n)

        tokens = jnp.asarray(padded_ids, dtype=jnp.int32)
        attn_mask = tokens > 0
        logits = jax.block_until_ready(
            model_apply(self.params, tokens, attn_mask))          # [n_pad, 3]
        results = np.asarray(logits)[:n].tolist()
        return np.array(results)

    __call__ = forward


# ---------------------------------- main -----------------------------------
if __name__ == "__main__":
    key = jax.random.PRNGKey(0)
    k_params, k_ids = jax.random.split(key)
    params, ref_w = init_params(k_params)

    # Build 4 deterministic "instances" of space-separated token-id strings,
    # with varying lengths so padding / masking is exercised (seq <= 8).
    lengths = [5, 8, 3, 6]
    all_ids = jax.random.randint(k_ids, (sum(lengths),), 1, VOCAB)
    all_ids = np.asarray(all_ids).tolist()
    token_strings, off = [], 0
    for L in lengths:
        token_strings.append(' '.join(str(t) for t in all_ids[off:off + L]))
        off += L

    # Run the Pallas kernel once directly and block on it.
    probe_tokens = jnp.asarray(
        [all_ids[:8], all_ids[8:16]], dtype=jnp.int32)            # [2, 8]
    probe_logits = model_apply(params, probe_tokens, probe_tokens > 0)
    jax.block_until_ready(probe_logits)
    assert probe_logits.shape == (2, LABELS)

    # Pure-JAX f32 reference (loose tolerance: folded table + head are bf16).
    def ref_logits(tokens):
        emb = jnp.take(ref_w['emb'], tokens, axis=0)
        mask = (tokens > 0).astype(jnp.float32)[:, :, None]
        h = jnp.maximum(emb @ ref_w['w1'] + ref_w['b1'], 0.0)
        denom = jnp.maximum(mask.sum(axis=1), 1.0)
        pooled = (h * mask).sum(axis=1) / denom
        return (pooled @ ref_w['w2p'] + ref_w['b2p'])[:, :LABELS]

    np.testing.assert_allclose(np.asarray(probe_logits),
                               np.asarray(ref_logits(probe_tokens)),
                               rtol=5e-2, atol=1e-3)

    # Full wrapper forward (parse, pad, mask, batched logits) -> np.array.
    wrapper = BertModelWrapper(params, PAD_ID, args)
    out = wrapper(token_strings)
    assert out.shape == (len(token_strings), LABELS)
    assert np.all(np.isfinite(out))
    np.testing.assert_allclose(
        out,
        np.asarray(ref_logits(jnp.asarray(
            [ids + [PAD_ID] * (8 - L) for ids, L in
             zip([[int(t) for t in s.split(' ')] for s in token_strings],
                 lengths)], dtype=jnp.int32))),
        rtol=5e-2, atol=1e-3)

    print("KERNEL_OK")
</pallas_src>

<mosaic_0001>
module attributes {stable_mosaic.version = 11 : i64} {
  func.func @_classifier_kernel(%arg0: i32, %arg1: memref<8x8x128xbf16, #tpu.memory_space<vmem>>, %arg2: memref<8x8xf32, #tpu.memory_space<vmem>>, %arg3: memref<128x128xbf16, #tpu.memory_space<vmem>>, %arg4: memref<1x128xf32, #tpu.memory_space<vmem>>, %arg5: memref<8x128xf32, #tpu.memory_space<vmem>>) attributes {dimension_semantics = [#tpu.dimension_semantics<parallel>], iteration_bounds = array<i64: 1>, scalar_prefetch = 0 : i64, scratch_operands = 0 : i64, tpu.core_type = #tpu.core_type<tc>, window_params = [{transform_indices = @transform_0, window_bounds = array<i64: 8, 8, 128>}, {transform_indices = @transform_1, window_bounds = array<i64: 8, 8>}, {pipeline_mode = #tpu.pipeline_mode<synchronous>, transform_indices = @transform_2, window_bounds = array<i64: 128, 128>}, {pipeline_mode = #tpu.pipeline_mode<synchronous>, transform_indices = @transform_3, window_bounds = array<i64: 1, 128>}, {transform_indices = @transform_4, window_bounds = array<i64: 8, 128>}]} {
    %c0 = arith.constant 0 : index
    %c0_0 = arith.constant 0 : index
    %c0_1 = arith.constant 0 : index
    %0 = vector.load %arg1[%c0, %c0_0, %c0_1] : memref<8x8x128xbf16, #tpu.memory_space<vmem>>, vector<8x8x128xbf16>
    %1 = arith.extf %0 : vector<8x8x128xbf16> to vector<8x8x128xf32>
    %cst = arith.constant 0.000000e+00 : f32
    %2 = vector.broadcast %cst : f32 to vector<8x8x128xf32>
    %3 = arith.maximumf %1, %2 : vector<8x8x128xf32>
    %c0_2 = arith.constant 0 : index
    %c0_3 = arith.constant 0 : index
    %4 = vector.load %arg2[%c0_2, %c0_3] : memref<8x8xf32, #tpu.memory_space<vmem>>, vector<8x8xf32>
    %5 = vector.shape_cast %4 : vector<8x8xf32> to vector<8x8x1xf32>
    %6 = vector.broadcast %5 : vector<8x8x1xf32> to vector<8x8x128xf32>
    %7 = arith.mulf %3, %6 : vector<8x8x128xf32>
    %cst_4 = arith.constant dense<0.000000e+00> : vector<8x128xf32>
    %8 = vector.multi_reduction <add>, %7, %cst_4 [1] : vector<8x8x128xf32> to vector<8x128xf32>
    %9 = arith.truncf %8 : vector<8x128xf32> to vector<8x128xbf16>
    %c0_5 = arith.constant 0 : index
    %c0_6 = arith.constant 0 : index
    %10 = vector.load %arg3[%c0_5, %c0_6] : memref<128x128xbf16, #tpu.memory_space<vmem>>, vector<128x128xbf16>
    %cst_7 = arith.constant dense<0.000000e+00> : vector<8x128xf32>
    %11 = tpu.matmul %9, %10, %cst_7 {dimension_numbers = #tpu.dot_dimension_numbers<[1], [0], [0], [1], [0, 0, 1, 1], [], []>} : vector<8x128xbf16>, vector<128x128xbf16>, vector<8x128xf32> -> vector<8x128xf32>
    %c0_8 = arith.constant 0 : index
    %c0_9 = arith.constant 0 : index
    %12 = vector.load %arg4[%c0_8, %c0_9] : memref<1x128xf32, #tpu.memory_space<vmem>>, vector<1x128xf32>
    %13 = vector.broadcast %12 : vector<1x128xf32> to vector<8x128xf32>
    %14 = arith.addf %11, %13 : vector<8x128xf32>
    %c0_10 = arith.constant 0 : index
    %c0_11 = arith.constant 0 : index
    %15 = vector.load %arg5[%c0_10, %c0_11] : memref<8x128xf32, #tpu.memory_space<vmem>>, vector<8x128xf32>
    tpu.vector_store %arg5[%c0_10, %c0_11], %14 {strides = array<i32>} : memref<8x128xf32, #tpu.memory_space<vmem>>, vector<8x128xf32>,
    return
  }
  func.func @transform_0(%arg0: i32) -> (i32, i32, i32) {
    %c0_i32 = arith.constant 0 : i32
    %c0_i32_0 = arith.constant 0 : i32
    %c0_i32_1 = arith.constant 0 : i32
    return %arg0, %c0_i32, %c0_i32_0 : i32, i32, i32
  }
  func.func @transform_1(%arg0: i32) -> (i32, i32) {
    %c0_i32 = arith.constant 0 : i32
    %c0_i32_0 = arith.constant 0 : i32
    return %arg0, %c0_i32 : i32, i32
  }
  func.func @transform_2(%arg0: i32) -> (i32, i32) {
    %c0_i32 = arith.constant 0 : i32
    %c0_i32_0 = arith.constant 0 : i32
    %c0_i32_1 = arith.constant 0 : i32
    return %c0_i32, %c0_i32_0 : i32, i32
  }
  func.func @transform_3(%arg0: i32) -> (i32, i32) {
    %c0_i32 = arith.constant 0 : i32
    %c0_i32_0 = arith.constant 0 : i32
    %c0_i32_1 = arith.constant 0 : i32
    return %c0_i32, %c0_i32_0 : i32, i32
  }
  func.func @transform_4(%arg0: i32) -> (i32, i32) {
    %c0_i32 = arith.constant 0 : i32
    %c0_i32_0 = arith.constant 0 : i32
    return %arg0, %c0_i32 : i32, i32
  }
}

</mosaic_0001>

<bundles_post_ra>
// kernel: model_apply.1
= control target key start
LH: loop header
LB: loop body
LE: loop exit
PB: predicated region body
PF: predicated region fallthrough
CT: control target
= control target key end

     0   :  { %v43_v0 = vlaneseq  ;;  %v378_v1 = vmov 0.0   ;;  %vm379_vm0 = vmmov 0   ;;  %vm202_vm1 = vcmask 1041409   ;;  %s450_s1 = inlined_call_operand.vmem [shape: f32[8,8], index: 1, kind: input, shape index: {}]   ;;  %s451_s2 = inlined_call_operand.vmem [shape: bf16[128,128], index: 2, kind: input, shape index: {}]   ;;  %s452_s0 = inlined_call_operand.vmem [shape: bf16[8,8,128], index: 0, kind: input, shape index: {}]   ;;  %s453_s3 = inlined_call_operand.vmem [shape: f32[1,128], index: 3, kind: input, shape index: {}]   ;;  %s454_s4 = inlined_call_operand.vmem [shape: f32[8,128], index: 4, kind: output, shape index: {}]  }
   0x1   :  { %348 = vmatprep.subr.bf16.mxu0 %v378_v1  ;;  %v370_v3 = vld [vmem:[%s451_s2] sm:$0xff]   ;;  %v371_v9 = vld [vmem:[%s451_s2 + $0x8] sm:$0xff]   ;;  %v372_v16 = vld [vmem:[%s451_s2 + $0x10] sm:$0xff]   ;;  %364 = vmatprep.mubr.msk.bf16.mxu0 %vm379_vm0, %v378_v1  ;;  %vm204_vm2 = vcmask 1042434   ;;  %vm206_vm3 = vcmask 1043459   ;;  %vm208_vm4 = vcmask 1044484  }
   0x2   :  { %v44_v2 = vshrl.u32 %v43_v0, 7  ;;  %v42_v4 = vld [vmem:[%s450_s1] sm:$0xff]  ;;  %349 = vmatpush3.bf16.msra.mxu0 %v370_v3  ;;  %v373_v21 = vld [vmem:[%s451_s2 + $0x18] sm:$0xff]   ;;  %v375_v25 = vld [vmem:[%s451_s2 + $0x28] sm:$0xff]   ;;  %vm210_vm5 = vcmask 1045509   ;;  %vm212_vm6 = vcmask 1046534  }
   0x3   :  { %350 = vmatprep.subr.bf16.mxu0 %v378_v1  ;;  %v374_v24 = vld [vmem:[%s451_s2 + $0x20] sm:$0xff]   ;;  %v376_v26 = vld [vmem:[%s451_s2 + $0x30] sm:$0xff]   ;;  %v377_v27 = vld [vmem:[%s451_s2 + $0x38] sm:$0xff]   ;;  %vm214_vm7 = vcmask 1047559  }
   0x4   :  { %v59_v5 = vsub.s32 2, %v44_v2  ;;  %v45_v6 = vsub.s32 0, %v44_v2  ;;  %v66_v7 = vsub.s32 3, %v44_v2  ;;  %v52_v8 = vsub.s32 1, %v44_v2  ;;  %v336_v28 = vld [vmem:[%s452_s0 + $0x8] sm:$0xff]   ;;  %v321_v29 = vld [vmem:[%s452_s0] sm:$0xff]  }
   0x5   :  { %v80_v14 = vsub.s32 5, %v44_v2  ;;  %v73_v15 = vsub.s32 4, %v44_v2  ;;  %v94_v19 = vsub.s32 7, %v44_v2  ;;  %v87_v20 = vsub.s32 6, %v44_v2  ;;  %v337_v36 = vld [vmem:[%s452_s0 + $0x10] sm:$0xff]   ;;  %v338_v47 = vld [vmem:[%s452_s0 + $0x18] sm:$0xff]  }
   0x6   :  { %v60_v10 = vrot.slane %v42_v4, %v59_v5  ;;  %v46_v11 = vrot.slane %v42_v4, %v45_v6  ;;  %v67_v12 = vrot.slane %v42_v4, %v66_v7  ;;  %v53_v13 = vrot.slane %v42_v4, %v52_v8  ;;  %351 = vmatpush3.bf16.msra.mxu0 %v371_v9 }
   0x7   :  { %352 = vmatprep.subr.bf16.mxu0 %v378_v1  ;;  %v81_v17 = vrot.slane %v42_v4, %v80_v14  ;;  %v74_v18 = vrot.slane %v42_v4, %v73_v15  ;;  %v95_v22 = vrot.slane %v42_v4, %v94_v19  ;;  %v88_v23 = vrot.slane %v42_v4, %v87_v20 }
   0x8   :  { %62 = vbcast.lane.b32.xlu1 %v60_v10, 256  ;;  %48 = vbcast.lane.b32.xlu0 %v46_v11, 256  ;;  %v326_v30 = vunpack.c.l.bf16 %v336_v28  ;;  %v322_v31 = vunpack.c.l.bf16 %v321_v29  ;;  %v327_v34 = vunpack.c.h.bf16 %v336_v28  ;;  %v323_v35 = vunpack.c.h.bf16 %v321_v29 }
   0x9   :  { %v331_v43 = vunpack.c.h.bf16 %v337_v36  ;;  %v330_v44 = vunpack.c.l.bf16 %v337_v36  ;;  %v335_v56 = vunpack.c.h.bf16 %v338_v47  ;;  %v334_v57 = vunpack.c.l.bf16 %v338_v47 }
   0xa   :  { %353 = vmatpush3.bf16.msra.mxu0 %v372_v16  ;;  %v36_v32 = vmax.f32 %v326_v30, 0.0  ;;  %v34_v33 = vmax.f32 %v322_v31, 0.0  ;;  %v37_v41 = vmax.f32 %v327_v34, 0.0  ;;  %v35_v42 = vmax.f32 %v323_v35, 0.0 }
   0xb   :  { %354 = vmatprep.subr.bf16.mxu0 %v378_v1  ;;  %v39_v54 = vmax.f32 %v331_v43, 0.0  ;;  %v38_v55 = vmax.f32 %v330_v44, 0.0  ;;  %v41_v6 = vmax.f32 %v335_v56, 0.0  ;;  %v40_v7 = vmax.f32 %v334_v57, 0.0 }
   0xc   :  { %69 = vbcast.lane.b32.xlu1 %v67_v12, 256  ;;  %55 = vbcast.lane.b32.xlu0 %v53_v13, 256 }
   0xe   :  { %355 = vmatpush3.bf16.msra.mxu0 %v373_v21 }
   0xf   :  { %356 = vmatprep.subr.bf16.mxu0 %v378_v1 }
  0x10   :  { %83 = vbcast.lane.b32.xlu1 %v81_v17, 256  ;;  %76 = vbcast.lane.b32.xlu0 %v74_v18, 256 }
  0x12   :  { %357 = vmatpush3.bf16.msra.mxu0 %v374_v24 }
  0x13   :  { %358 = vmatprep.subr.bf16.mxu0 %v378_v1 }
  0x14   :  { %97 = vbcast.lane.b32.xlu1 %v95_v22, 256  ;;  %90 = vbcast.lane.b32.xlu0 %v88_v23, 256 }
  0x16   :  { %359 = vmatpush3.bf16.msra.mxu0 %v375_v25 }
  0x17   :  { %360 = vmatprep.subr.bf16.mxu0 %v378_v1 }
  0x1a   :  { %361 = vmatpush3.bf16.msra.mxu0 %v376_v26 }
  0x1b   :  { %362 = vmatprep.subr.bf16.mxu0 %v378_v1 }
  0x1e   :  { %363 = vmatpush3.bf16.msra.mxu0 %v377_v27 }
  0x7a   :  { %v63_v37 = vpop.permute.xlu1 %62  ;;  %v49_v38 = vpop.permute.xlu0 %48 }
  0x7b   :  { %v101_v39 = vmul.f32 %v63_v37, %v36_v32  ;;  %v99_v40 = vmul.f32 %v49_v38, %v34_v33 }
  0x7d   :  { %v119_v45 = vrot.slane %v101_v39, 4  ;;  %v107_v46 = vrot.slane %v99_v40, 4 }
  0x7e   :  { %v70_v48 = vpop.permute.xlu1 %69  ;;  %v56_v49 = vpop.permute.xlu0 %55 }
  0x7f   :  { %v120_v50 = vadd.f32 %v119_v45, %v101_v39  ;;  %v108_v51 = vadd.f32 %v107_v46, %v99_v40  ;;  %v102_v52 = vmul.f32 %v70_v48, %v37_v41  ;;  %v100_v53 = vmul.f32 %v56_v49, %v35_v42 }
  0x81   :  { %v121_v58 = vrot.slane %v120_v50, 2  ;;  %v109_v59 = vrot.slane %v108_v51, 2  ;;  %v125_v60 = vrot.slane %v102_v52, 4  ;;  %v113_v61 = vrot.slane %v100_v53, 4 }
  0x82   :  { %v84_v62 = vpop.permute.xlu1 %83  ;;  %v77_v63 = vpop.permute.xlu0 %76 }
  0x83   :  { %v122_v0 = vadd.f32 %v121_v58, %v120_v50  ;;  %v110_v1 = vadd.f32 %v109_v59, %v108_v51  ;;  %v126_v2 = vadd.f32 %v125_v60, %v102_v52  ;;  %v114_v3 = vadd.f32 %v113_v61, %v100_v53 }
  0x84   :  { %v104_v4 = vmul.f32 %v84_v62, %v39_v54  ;;  %v103_v5 = vmul.f32 %v77_v63, %v38_v55 }
  0x85   :  { %v123_v8 = vrot.slane %v122_v0, 1  ;;  %v111_v9 = vrot.slane %v110_v1, 1  ;;  %v127_v10 = vrot.slane %v126_v2, 2  ;;  %v115_v11 = vrot.slane %v114_v3, 2 }
  0x86   :  { %v137_v12 = vrot.slane %v104_v4, 4  ;;  %v131_v13 = vrot.slane %v103_v5, 4  ;;  %v98_v14 = vpop.permute.xlu1 %97  ;;  %v91_v15 = vpop.permute.xlu0 %90 }
  0x87   :  { %v124_v16 = vadd.f32 %v123_v8, %v122_v0  ;;  %v112_v17 = vadd.f32 %v111_v9, %v110_v1  ;;  %v128_v18 = vadd.f32 %v127_v10, %v126_v2  ;;  %v116_v19 = vadd.f32 %v115_v11, %v114_v3  ;;  %v311_v8 = vld [vmem:[%s453_s3] ss:$0 sm:$0xff] }
  0x88   :  { %v138_v20 = vadd.f32 %v137_v12, %v104_v4  ;;  %v132_v21 = vadd.f32 %v131_v13, %v103_v5  ;;  %v106_v22 = vmul.f32 %v98_v14, %v41_v6  ;;  %v105_v23 = vmul.f32 %v91_v15, %v40_v7 }
  0x89   :  { %v129_v24 = vrot.slane %v128_v18, 1  ;;  %v117_v25 = vrot.slane %v116_v19, 1  ;;  %v157_v30 = vpack.c.bf16 %v124_v16, %v124_v16  ;;  %v155_v31 = vpack.c.bf16 %v112_v17, %v112_v17 }
  0x8a   :  { %v139_v26 = vrot.slane %v138_v20, 2  ;;  %v133_v27 = vrot.slane %v132_v21, 2  ;;  %v149_v28 = vrot.slane %v106_v22, 4  ;;  %v143_v29 = vrot.slane %v105_v23, 4 }
  0x8b   :  { %v130_v32 = vadd.f32 %v129_v24, %v128_v18  ;;  %v118_v33 = vadd.f32 %v117_v25, %v116_v19  ;;  %v196_v44 = vunpack.c.l.b16 %v157_v30  ;;  %v194_v45 = vunpack.c.l.b16 %v155_v31 }
  0x8c   :  { %v140_v34 = vadd.f32 %v139_v26, %v138_v20  ;;  %v134_v35 = vadd.f32 %v133_v27, %v132_v21  ;;  %v150_v36 = vadd.f32 %v149_v28, %v106_v22  ;;  %v144_v37 = vadd.f32 %v143_v29, %v105_v23 }
  0x8d   :  { %v158_v38 = vpack.c.bf16 %v130_v32, %v130_v32  ;;  %v156_v39 = vpack.c.bf16 %v118_v33, %v118_v33 }
  0x8e   :  { %v141_v40 = vrot.slane %v140_v34, 1  ;;  %v135_v41 = vrot.slane %v134_v35, 1  ;;  %v151_v42 = vrot.slane %v150_v36, 2  ;;  %v145_v43 = vrot.slane %v144_v37, 2 }
  0x8f   :  { %v195_v46 = vunpack.c.l.b16 %v156_v39  ;;  %v197_v51 = vunpack.c.l.b16 %v158_v38 }
  0x90   :  { %v142_v47 = vadd.f32 %v141_v40, %v140_v34  ;;  %v136_v48 = vadd.f32 %v135_v41, %v134_v35  ;;  %v152_v49 = vadd.f32 %v151_v42, %v150_v36  ;;  %v146_v50 = vadd.f32 %v145_v43, %v144_v37 }
  0x91   :  { %v203_v52 = vsel %vm202_vm1, %v195_v46, %v194_v45 }
  0x92   :  { %v205_v53 = vsel %vm204_vm2, %v196_v44, %v203_v52  ;;  %v160_v54 = vpack.c.bf16 %v142_v47, %v142_v47  ;;  %v159_v55 = vpack.c.bf16 %v136_v48, %v136_v48  ;;  %v153_v56 = vrot.slane %v152_v49, 1 }
  0x93   :  { %v147_v57 = vrot.slane %v146_v50, 1  ;;  %v207_v60 = vsel %vm206_vm3, %v197_v51, %v205_v53 }
  0x94   :  { %v198_v58 = vunpack.c.l.b16 %v159_v55  ;;  %v154_v59 = vadd.f32 %v153_v56, %v152_v49  ;;  %v199_v62 = vunpack.c.l.b16 %v160_v54 }
  0x95   :  { %v148_v61 = vadd.f32 %v147_v57, %v146_v50 }
  0x96   :  { %v162_v63 = vpack.c.bf16 %v154_v59, %v154_v59  ;;  %v209_v1 = vsel %vm208_vm4, %v198_v58, %v207_v60 }
  0x97   :  { %v161_v0 = vpack.c.bf16 %v148_v61, %v148_v61  ;;  %v211_v4 = vsel %vm210_vm5, %v199_v62, %v209_v1 }
  0x98   :  { %v201_v2 = vunpack.c.l.b16 %v162_v63 }
  0x99   :  { %v200_v3 = vunpack.c.l.b16 %v161_v0 }
  0x9b   :  { %v213_v5 = vsel %vm212_vm6, %v200_v3, %v211_v4 }
  0x9c   :  { %v215_v6 = vsel %vm214_vm7, %v201_v2, %v213_v5 }
  0x9d   :  { %v216_v7 = vpack.c.b16 %v215_v6, %v215_v6 }
  0x9f   :  { %365 = vmatmul.mubr.bf16.vlgmr.msra.gmra.mrb[0].mxu0 %v216_v7 }
 0x172   :  { %v300_v9 = vpop.f32.mrb[0].mxu0 }
 0x173   :  { %v301_v10 = vadd.f32 %v311_v8, %v300_v9  ;;  %v366_v11 = vpop.f32.mrb[1].mxu0 }
 0x174   :  { %v303_v12 = vpop.f32.mrb[2].mxu0 }
 0x175   :  { %306 = vst [vmem:[%s454_s4] sm:$0xff] %v301_v10  ;;  %v367_v13 = vpop.f32.mrb[3].mxu0 }

</bundles_post_ra>
